<compile_context>
chip_gen: v6e
topology: v6e:2x2x1
jax: 0.10.0
libtpu: 0.0.40
codegen_flags: <defaults>
</compile_context>

<pallas_src>
import functools
import math

import jax
import jax.numpy as jnp
from jax import lax
from jax.experimental import pallas as pl
from jax.experimental.pallas import tpu as pltpu


def _interp_matrix(in_size: int, out_size: int) -> jnp.ndarray:
    """Align-corners linear interpolation matrix W: (out_size, in_size)."""
    if out_size == 1:
        src = jnp.zeros((1,), dtype=jnp.float32)
    else:
        src = jnp.arange(out_size, dtype=jnp.float32) * (
            (in_size - 1) / (out_size - 1)
        )
    lo = jnp.clip(jnp.floor(src).astype(jnp.int32), 0, in_size - 1)
    hi = jnp.clip(lo + 1, 0, in_size - 1)
    frac = src - lo.astype(jnp.float32)
    rows = jnp.arange(out_size)
    w = jnp.zeros((out_size, in_size), dtype=jnp.float32)
    w = w.at[rows, lo].add(1.0 - frac)
    w = w.at[rows, hi].add(frac)
    return w


def _choose_planes_per_step(nplanes: int, h_in: int, w_in: int,
                            h_out: int, w_out: int,
                            budget_bytes: int = 6 * 1024 * 1024) -> int:
    """Largest divisor of nplanes that fits the VMEM budget and keeps >=2 grid steps."""
    # f32 bytes per plane: double-buffered input + output blocks, plus the
    # (h_out, w_in) intermediate and the per-plane broadcast of Wh.
    per_plane = 4 * (2 * h_in * w_in + 2 * h_out * w_out
                     + h_out * w_in + h_out * h_in)
    cap = max(1, budget_bytes // max(per_plane, 1))
    if nplanes >= 2:
        cap = min(cap, nplanes // 2)   # keep >=2 grid steps (v7x megacore)
    cap = int(max(1, min(cap, nplanes)))
    for b in range(cap, 0, -1):
        if nplanes % b == 0:
            return b
    return 1


def _resize_flow_kernel(x_ref, wh_ref, wwt_ref, o_ref, *,
                        planes: int, h_in: int, h_out: int):
    # x_ref:  (planes, H_in, W_in)
    # wh_ref: (H_out, H_in)   -- flow scale already folded in
    # wwt_ref:(W_in,  W_out)
    # o_ref:  (planes, H_out, W_out)
    x3 = x_ref[...].astype(jnp.float32)                       # (P, H_in, W_in)
    w_in = x3.shape[-1]

    # --- H interpolation: batched MXU matmul over the whole block ----------
    whb = jnp.broadcast_to(wh_ref[...], (planes, h_out, h_in))
    t = lax.dot_general(
        whb, x3,
        dimension_numbers=(((2,), (1,)), ((0,), (0,))),
        preferred_element_type=jnp.float32)                   # (P, H_out, W_in)

    # --- W interpolation: ONE fused matmul over all planes/rows ------------
    t2 = t.reshape(planes * h_out, w_in)                      # leading-dim collapse
    y = jnp.dot(t2, wwt_ref[...],
                preferred_element_type=jnp.float32)           # (P*H_out, W_out)

    o_ref[...] = y.reshape(planes, h_out, -1).astype(o_ref.dtype)


def resize_flow(x: jnp.ndarray, scale_factor: float) -> jnp.ndarray:
    """ResizeFlow.forward for ndim=2 (bilinear). x: (N, C, H, W)."""
    if scale_factor == 1.0:
        return x

    n, c, h_in, w_in = x.shape
    # recompute_scale_factor=True  =>  out = floor(in * scale_factor) (double math)
    h_out = int(math.floor(h_in * float(scale_factor)))
    w_out = int(math.floor(w_in * float(scale_factor)))

    # Fold the flow rescale into the H weight matrix (interp is linear, so
    # scale-then-interp == interp-then-scale == folded-weights).
    wh = (float(scale_factor) * _interp_matrix(h_in, h_out)).astype(jnp.float32)
    wwt = _interp_matrix(w_in, w_out).T.astype(jnp.float32)    # (W_in, W_out)

    nplanes = n * c
    planes = _choose_planes_per_step(nplanes, h_in, w_in, h_out, w_out)
    grid = (nplanes // planes,)

    x_flat = x.reshape(nplanes, h_in, w_in)

    kernel = functools.partial(_resize_flow_kernel,
                               planes=planes, h_in=h_in, h_out=h_out)

    flops = 2 * nplanes * (h_out * h_in * w_in + h_out * w_in * w_out)
    bytes_accessed = (x.dtype.itemsize * nplanes * (h_in * w_in + h_out * w_out)
                      + 4 * (h_out * h_in + w_in * w_out))

    out_flat = pl.pallas_call(
        kernel,
        out_shape=jax.ShapeDtypeStruct((nplanes, h_out, w_out), x.dtype),
        grid_spec=pltpu.PrefetchScalarGridSpec(
            num_scalar_prefetch=0,
            grid=grid,
            in_specs=[
                pl.BlockSpec((planes, h_in, w_in), lambda b: (b, 0, 0)),
                pl.BlockSpec((h_out, h_in), lambda b: (0, 0)),
                pl.BlockSpec((w_in, w_out), lambda b: (0, 0)),
            ],
            out_specs=pl.BlockSpec((planes, h_out, w_out), lambda b: (b, 0, 0)),
        ),
        compiler_params=pltpu.CompilerParams(
            dimension_semantics=("parallel",),
            vmem_limit_bytes=48 * 1024 * 1024,   # safe on v5e/v6e (128 MiB) and v7x (64 MiB)
        ),
        cost_estimate=pl.CostEstimate(
            flops=flops, transcendentals=0, bytes_accessed=bytes_accessed),
    )(x_flat, wh, wwt)

    return out_flat.reshape(n, c, h_out, w_out)


def _reference(x: jnp.ndarray, scale_factor: float) -> jnp.ndarray:
    """Pure-JAX reference using the same separable formulation (full f32)."""
    if scale_factor == 1.0:
        return x
    n, c, h_in, w_in = x.shape
    h_out = int(math.floor(h_in * float(scale_factor)))
    w_out = int(math.floor(w_in * float(scale_factor)))
    wh = _interp_matrix(h_in, h_out)
    ww = _interp_matrix(w_in, w_out)
    y = jnp.einsum("oh,nchw->ncow", wh, x.astype(jnp.float32),
                   precision=lax.Precision.HIGHEST)
    y = jnp.einsum("pw,ncow->ncop", ww, y,
                   precision=lax.Precision.HIGHEST)
    return (scale_factor * y).astype(x.dtype)


if __name__ == "__main__":
    key = jax.random.PRNGKey(0)
    # 2-D flow field: N=2, C=2 (u, v components), H=W=16
    x = jax.random.normal(key, (2, 2, 16, 16), dtype=jnp.float32)

    # Upscale branch (scale > 1): scale-then-interp in the PyTorch module.
    out = jax.block_until_ready(resize_flow(x, 2.0))
    ref = _reference(x, 2.0)
    assert out.shape == (2, 2, 32, 32), out.shape
    assert jnp.allclose(out, ref, atol=1e-5, rtol=1e-5), float(
        jnp.max(jnp.abs(out - ref)))

    # Downscale branch (scale < 1): interp-then-scale in the PyTorch module.
    out2 = jax.block_until_ready(resize_flow(x, 0.5))
    ref2 = _reference(x, 0.5)
    assert out2.shape == (2, 2, 8, 8), out2.shape
    assert jnp.allclose(out2, ref2, atol=1e-5, rtol=1e-5), float(
        jnp.max(jnp.abs(out2 - ref2)))

    print("KERNEL_OK")
</pallas_src>

<mosaic_0001>
module attributes {stable_mosaic.version = 11 : i64} {
  func.func @_resize_flow_kernel(%arg0: i32, %arg1: memref<2x16x16xf32, #tpu.memory_space<vmem>>, %arg2: memref<32x16xf32, #tpu.memory_space<vmem>>, %arg3: memref<16x32xf32, #tpu.memory_space<vmem>>, %arg4: memref<2x32x32xf32, #tpu.memory_space<vmem>>) attributes {dimension_semantics = [#tpu.dimension_semantics<parallel>], iteration_bounds = array<i64: 2>, scalar_prefetch = 0 : i64, scratch_operands = 0 : i64, tpu.core_type = #tpu.core_type<tc>, window_params = [{transform_indices = @transform_0, window_bounds = array<i64: 2, 16, 16>}, {pipeline_mode = #tpu.pipeline_mode<synchronous>, transform_indices = @transform_1, window_bounds = array<i64: 32, 16>}, {pipeline_mode = #tpu.pipeline_mode<synchronous>, transform_indices = @transform_2, window_bounds = array<i64: 16, 32>}, {transform_indices = @transform_3, window_bounds = array<i64: 2, 32, 32>}]} {
    %c0 = arith.constant 0 : index
    %c0_0 = arith.constant 0 : index
    %c0_1 = arith.constant 0 : index
    %0 = vector.load %arg1[%c0, %c0_0, %c0_1] : memref<2x16x16xf32, #tpu.memory_space<vmem>>, vector<2x16x16xf32>
    %c0_2 = arith.constant 0 : index
    %c0_3 = arith.constant 0 : index
    %1 = vector.load %arg2[%c0_2, %c0_3] : memref<32x16xf32, #tpu.memory_space<vmem>>, vector<32x16xf32>
    %2 = vector.shape_cast %1 : vector<32x16xf32> to vector<1x32x16xf32>
    %3 = vector.broadcast %2 : vector<1x32x16xf32> to vector<2x32x16xf32>
    %cst = arith.constant dense<0.000000e+00> : vector<2x32x16xf32>
    %4 = tpu.matmul %3, %0, %cst {dimension_numbers = #tpu.dot_dimension_numbers<[2], [1], [1], [2], [0, 0, 0, 1, 1, 2], [0], [0]>} : vector<2x32x16xf32>, vector<2x16x16xf32>, vector<2x32x16xf32> -> vector<2x32x16xf32>
    %5 = vector.shape_cast %4 : vector<2x32x16xf32> to vector<64x16xf32>
    %c0_4 = arith.constant 0 : index
    %c0_5 = arith.constant 0 : index
    %6 = vector.load %arg3[%c0_4, %c0_5] : memref<16x32xf32, #tpu.memory_space<vmem>>, vector<16x32xf32>
    %cst_6 = arith.constant dense<0.000000e+00> : vector<64x32xf32>
    %7 = tpu.matmul %5, %6, %cst_6 {dimension_numbers = #tpu.dot_dimension_numbers<[1], [0], [0], [1], [0, 0, 1, 1], [], []>} : vector<64x16xf32>, vector<16x32xf32>, vector<64x32xf32> -> vector<64x32xf32>
    %8 = vector.shape_cast %7 : vector<64x32xf32> to vector<2x32x32xf32>
    %c0_7 = arith.constant 0 : index
    %c0_8 = arith.constant 0 : index
    %c0_9 = arith.constant 0 : index
    %9 = vector.load %arg4[%c0_7, %c0_8, %c0_9] : memref<2x32x32xf32, #tpu.memory_space<vmem>>, vector<2x32x32xf32>
    tpu.vector_store %arg4[%c0_7, %c0_8, %c0_9], %8 {strides = array<i32>} : memref<2x32x32xf32, #tpu.memory_space<vmem>>, vector<2x32x32xf32>,
    return
  }
  func.func @transform_0(%arg0: i32) -> (i32, i32, i32) {
    %c0_i32 = arith.constant 0 : i32
    %c0_i32_0 = arith.constant 0 : i32
    %c0_i32_1 = arith.constant 0 : i32
    return %arg0, %c0_i32, %c0_i32_0 : i32, i32, i32
  }
  func.func @transform_1(%arg0: i32) -> (i32, i32) {
    %c0_i32 = arith.constant 0 : i32
    %c0_i32_0 = arith.constant 0 : i32
    %c0_i32_1 = arith.constant 0 : i32
    return %c0_i32, %c0_i32_0 : i32, i32
  }
  func.func @transform_2(%arg0: i32) -> (i32, i32) {
    %c0_i32 = arith.constant 0 : i32
    %c0_i32_0 = arith.constant 0 : i32
    %c0_i32_1 = arith.constant 0 : i32
    return %c0_i32, %c0_i32_0 : i32, i32
  }
  func.func @transform_3(%arg0: i32) -> (i32, i32, i32) {
    %c0_i32 = arith.constant 0 : i32
    %c0_i32_0 = arith.constant 0 : i32
    %c0_i32_1 = arith.constant 0 : i32
    return %arg0, %c0_i32, %c0_i32_0 : i32, i32, i32
  }
}

</mosaic_0001>

<bundles_post_ra>
// kernel: tpu_custom_call.1
= control target key start
LH: loop header
LB: loop body
LE: loop exit
PB: predicated region body
PF: predicated region fallthrough
CT: control target
= control target key end

     0   :  { %8 = vsyncpa [#allocation3], 0  ;;  %s1072_s0 = inlined_call_operand.hbm [shape: f32[4,16,16], index: 0, kind: input, shape index: {}]   ;;  %s1073_s1 = inlined_call_operand.vmem [shape: f32[32,16], index: 1, kind: input, shape index: {}]   ;;  %s1074_s2 = inlined_call_operand.vmem [shape: f32[16,32], index: 2, kind: input, shape index: {}]   ;;  %s1075_s3 = inlined_call_operand.hbm [shape: f32[4,32,32], index: 3, kind: output, shape index: {}]  }
   0x1   :  { %10 = vsyncpa [#allocation3 + $0x1], 0 }
   0x2   :  { %11 = vsyncpa [#allocation4], 0 }
   0x3   :  { %13 = vsyncpa [#allocation4 + $0x1], 0  ;;  %s875_s12 = smov 0   ;;  %s877_s13 = smov 0  }
   0x4   :  { %s879_s14 = smov 0   ;;  %s881_s15 = smov 0  }
   0x5 LB: > { %s896_s16 = sadd.s32 4294967295, %s847_s15   ;;  %s611_s17 = sadd.s32 4294967294, %s847_s15   ;;  %s847_s15 = sphi %s881_s15, %s1090_s15   ;;  %s843_s14 = sphi %s879_s14, %s1089_s14   ;;  %s839_s13 = sphi %s877_s13, %s1088_s13   ;;  %s835_s12 = sphi %s875_s12, %s1087_s12  }
   0x6   : > { %s900_s18 = sadd.s32 1, %s847_s15   ;;  %s26_s19 = sadd.s32 1, %s843_s14 }
   0x7   : > { %s23_s20 = ssub.s32 %s847_s15, %s900_s18  ;;  %p33_p0 = scmp.ne.s32.totalorder %s843_s14, %s839_s13 }
   0x8   : > { %p24_p1 = scmp.eq.s32.totalorder %s23_s20, 0  ;;  %p34_p2 = scmp.eq.s32.totalorder %s847_s15, 0 }
   0x9   : > { %p39_p3 = scmp.ne.s32.totalorder %s839_s13, %s835_s12  ;;  %p40_p4 = scmp.eq.s32.totalorder %s896_s16, 0 }
   0xa   : > { %s912_s21 = scalar_select %p24_p1, %s843_s14, %s26_s19  }
   0xb   : > { %p914_p5 = por %p34_p2, %p33_p0  ;;  %p918_p6 = por %p40_p4, %p39_p3 }
   0xc   : > { %p105_p7 = scmp.eq.s32.totalorder %s896_s16, 1  ;;  %p111_p8 = scmp.eq.s32.totalorder %s611_s17, 1 }
   0xd   : > { %s1079_s23 = scalar_select %p918_p6, 1, 0 }
   0xe   : > { %p717_p10 = scmp.lt.s32.totalorder %s847_s15, 2  ;;  %p925_p11 = por %p105_p7, %p33_p0 }
   0xf   : > { %p929_p12 = por %p111_p8, %p39_p3  ;;  %s137_s26 = sand.u32 1, %s843_s14  }
  0x10   : > { %s1080_s24 = scalar_select %p925_p11, 1, 0 }
  0x11   : > { %s1081_s25 = scalar_select %p929_p12, 1, 0 }
  0x12   : > { %s644_s27 = sshll.u32 %s847_s15, 9  ;;  %s614_s28 = sshll.u32 %s137_s26, 5 }
  0x13   : > { %s938_s4 = scalar_lea.hbm %s1072_s0, %s644_s27  ;;  %s141_s5 = scalar_lea.vmem [#allocation2], %s614_s28 }
  0x14   : > { %s149_s6 = sshll.u32 %s141_s5, 4  ;;  %p942_p13 = pnand %p717_p10, %p914_p5  ;;  %s946_s6 = int_to_ptr.vmem [resolvable:$true] %s149_s6 }
  0x15   : > { %s948_s8 = scalar_lea.sflag [#allocation3], %s137_s26  ;;  %s755_s9 = scalar_lea.hbm %s938_s4, 512 }
  0x16   : > { %p756_p0 = scmp.ne.s32.totalorder %s938_s4, %s755_s9  ;;  %p757_p1 = pneg %p942_p13 }
  0x17   : > { %s760_s17 = scalar_lea.hbm %s1072_s0, 1024  ;;  %p761_p4 = scmp.lt.s32.totalorder %s938_s4, %s1072_s0 }
  0x18   : > { %p758_p2 = pnand %p757_p1, %p756_p0  ;;  %p762_p5 = scmp.lt.s32.totalorder %s760_s17, %s755_s9 }
  0x1a   : > { %p759_p3 = pneg %p758_p2  ;;  %p763_p7 = por %p762_p5, %p761_p4 }
  0x1c   : > { %p764_p8 = pnand %p763_p7, %p759_p3 }
  0x1e   : > { %767 = shalt.err (!%p764_p8)
}
  0x1f   : > { %s768_s22 = scalar_lea.vmem %s946_s6, 512  ;;  %s849_s26 = smov [#allocation2]  }
  0x20   : > { %p769_p10 = scmp.ne.s32.totalorder %s946_s6, %s768_s22  ;;  %s773_s27 = sshll.u32 %s849_s26, 4  ;;  %s774_s27 = int_to_ptr.vmem [resolvable:$false] %s773_s27 }
  0x21   : > { %s775_s28 = scalar_lea.vmem %s774_s27, 1024  ;;  %p776_p2 = scmp.lt.s32.totalorder %s946_s6, %s774_s27 }
  0x22   : > { %p771_p9 = pnand %p769_p10, %p757_p1  ;;  %p777_p12 = scmp.lt.s32.totalorder %s775_s28, %s768_s22 }
  0x24   : > { %p772_p0 = pneg %p771_p9  ;;  %p778_p11 = por %p777_p12, %p776_p2 }
  0x26   : > { %p779_p6 = pnand %p778_p11, %p772_p0 }
  0x28   : > { %782 = shalt.err (!%p779_p6)
}
  0x29   : > { %s850_s29 = smov 128   ;;  %s851_s30 = smov 8  }
  0x2a   : > { %712 = dma.hbm_to_vmem [thread:$0]  (!%p942_p13), %s938_s4, 512, %s946_s6, %s948_s8, %s850_s29, %s850_s29, %s851_s30  }
  0x2b   : > { %p618_p9 = scmp.ge.s32.totalorder %s847_s15, 1  ;;  %p157_p1 = scmp.lt.s32.totalorder %s847_s15, 3 }
  0x2d   : > { %p158_p3 = pnand %p618_p9, %p157_p1 }
  0x2e   : > { %s972_s5 = sand.u32 (!%p158_p3), 1, %s839_s13   ;;  %p1083_p6 = scmp.ne.s32.totalorder (!%p158_p3), %s1079_s23, 0 }
  0x2f   : > { %161 = sbr.rel (%p158_p3) target bundleno = 475 (0x1db), region = 32  ;;  %s619_s9 = sshll.u32 (!%p158_p3), %s972_s5, 5 }
  0x30   : > { %s164_s10 = scalar_lea.sflag (!%p158_p3), [#allocation3], %s972_s5  ;;  %s167_s11 = scalar_lea.vmem (!%p158_p3), [#allocation2], %s619_s9 }
  0x34   : > { %826 = dma.done.wait (%p1083_p6), %s164_s10, 512  }
  0x35   : > { %828 = vsyncadd (%p1083_p6), %s164_s10, 4294966784  ;;  %vm200_vm0 = vcmask 130048   ;;  %v193_v0 = vld [vmem:[%s167_s11 + $0x8] sm:$0xff]  ;;  %v192_v1 = vld [vmem:[%s167_s11] sm:$0xff]  ;;  %s620_s29 = sshll.u32 %s972_s5, 6  ;;  %vm514_vm1 = vcmask 261120  }
  0x36   : > { %v196_v2 = vld [vmem:[%s1073_s1] sm:$0xff]  ;;  %669 = vmatprep.subr.mxu1 %v193_v0  ;;  %v197_v3 = vld [vmem:[%s1073_s1 + $0x8] sm:$0xff]  ;;  %v195_v4 = vld [vmem:[%s167_s11 + $0x18] sm:$0xff]  ;;  %s189_s30 = scalar_lea.vmem [#allocation5], %s620_s29  ;;  %s646_s10 = sshll.u32 %s896_s16, 10 }
  0x37   : > { %673 = vmatprep.mubr.msk.f32.mxu1 %vm200_vm0, %v196_v2  ;;  %670 = vmatpush3.msra.mxu1 %v193_v0  ;;  %v198_v5 = vld [vmem:[%s1073_s1 + $0x10] sm:$0xff]  ;;  %v199_v7 = vld [vmem:[%s1073_s1 + $0x18] sm:$0xff]  ;;  %v384_v8 = vld [vmem:[%s1074_s2 + $0x8] sm:$0xff]  ;;  %s538_s9 = sshll.u32 %s189_s30, 4  ;;  %s1027_s6 = scalar_lea.hbm %s1075_s3, %s646_s10  ;;  %s1021_s9 = int_to_ptr.vmem [resolvable:$true] %s538_s9 }
  0x38   : > { %671 = vmatprep.subr.mxu1 %v192_v1  ;;  %v194_v6 = vld [vmem:[%s167_s11 + $0x10] sm:$0xff]  ;;  %689 = vmatprep.subr.mxu0 %v384_v8  ;;  %v383_v9 = vld [vmem:[%s1074_s2] sm:$0xff]  ;;  %s524_s16 = scalar_lea.sflag [#allocation4], %s972_s5  ;;  %s783_s7 = scalar_lea.vmem %s1021_s9, 1024 }
  0x39   : > { %672 = vmatpush3.msra.mxu1 %v192_v1  ;;  %690 = vmatpush3.msra.mxu0 %v384_v8  ;;  %p784_p11 = scmp.ne.s32.totalorder %s1021_s9, %s783_s7  ;;  %p1084_p12 = scmp.ne.s32.totalorder %s1080_s24, 0 }
  0x3a   : > { %674 = vmatmul.mubr.msk.f32.vlgmr.msra.gmra.mxu1 %vm200_vm0, %v197_v3  ;;  %679 = vmatprep.subr.mxu1 %v195_v4  ;;  %s852_s8 = smov [#allocation5]  }
  0x3b   : > { %680 = vmatpush3.msra.mxu1 %v195_v4  ;;  %676 = vmatprep.mubr.msk.f32.mxu1 %vm200_vm0, %v198_v5  ;;  %p785_p13 = pnand %p784_p11, %p1084_p12  ;;  %s787_s17 = sshll.u32 %s852_s8, 4  ;;  %s788_s17 = int_to_ptr.vmem [resolvable:$false] %s787_s17 }
  0x3c   : > { %681 = vmatprep.subr.mxu1 %v194_v6  ;;  %691 = vmatprep.subr.mxu0 %v383_v9  ;;  %s789_s23 = scalar_lea.vmem %s788_s17, 2048  ;;  %p790_p5 = scmp.lt.s32.totalorder %s1021_s9, %s788_s17 }
  0x3d   : > { %682 = vmatpush3.msra.mxu1 %v194_v6  ;;  %692 = vmatpush3.msra.mxu0 %v383_v9  ;;  %p786_p4 = pneg %p785_p13  ;;  %p791_p7 = scmp.lt.s32.totalorder %s789_s23, %s783_s7 }
  0x3e   : > { %677 = vmatmul.mubr.msk.f32.gmra.mxu1 %vm200_vm0, %v199_v7 }
  0x3f   : > { %683 = vmatprep.mubr.msk.f32.mxu1 %vm200_vm0, %v196_v2  ;;  %p792_p8 = por %p791_p7, %p790_p5 }
  0x41   : > { %p793_p10 = pnand %p792_p8, %p786_p4 }
  0x42   : > { %684 = vmatmul.mubr.msk.f32.vlgmr.msra.gmra.mxu1 %vm200_vm0, %v197_v3 }
  0x43   : > { %686 = vmatprep.mubr.msk.f32.mxu1 %vm200_vm0, %v198_v5 }
  0x46   : > { %687 = vmatmul.mubr.msk.f32.gmra.mxu1 %vm200_vm0, %v199_v7 }
  0xfa   : > { %v675_v10 = vpop.f32.mrf.mxu1 }
  0xfc   : > { %v279_v11 = vpop.f32.mrf.mxu1 }
  0xfd   : > { %693 = vmatprep.mubr.msk.f32.mxu0 %vm200_vm0, %v279_v11 }
  0xfe   : > { %v678_v12 = vpop.f32.mrf.mxu1  ;;  %694 = vmatmul.mubr.msk.f32.vlgmr.msra.gmra.mxu0 %vm200_vm0, %v675_v10 }
 0x100   : > { %v289_v13 = vpop.f32.mrf.mxu1 }
 0x101   : > { %696 = vmatprep.mubr.msk.f32.mxu0 %vm200_vm0, %v289_v13 }
 0x102   : > { %v685_v14 = vpop.f32.mrf.mxu1  ;;  %697 = vmatmul.mubr.msk.f32.gmra.mxu0 %vm200_vm0, %v678_v12 }
 0x104   : > { %v364_v15 = vpop.f32.mrf.mxu1 }
 0x105   : > { %699 = vmatprep.mubr.msk.f32.mxu0 %vm200_vm0, %v364_v15 }
 0x106   : > { %v688_v16 = vpop.f32.mrf.mxu1  ;;  %700 = vmatmul.mubr.msk.f32.gmra.mxu0 %vm200_vm0, %v685_v14 }
 0x108   : > { %v374_v17 = vpop.f32.mrf.mxu1 }
 0x109   : > { %702 = vmatprep.mubr.msk.f32.mxu0 %vm200_vm0, %v374_v17 }
 0x10a   : > { %703 = vmatmul.mubr.msk.f32.gmra.mxu0 %vm200_vm0, %v688_v16 }
 0x1be   : > { %v695_v18 = vpop.f32.mrf.mxu0 }
 0x1bf   : > { %516 = vst.msk [vmem:[%s189_s30 + $0x8] sm:$0xff] %vm514_vm1, %v695_v18 }
 0x1c0   : > { %v475_v19 = vpop.f32.mrf.mxu0 }
 0x1c1   : > { %515 = vst.msk [vmem:[%s189_s30] sm:$0xff] %vm514_vm1, %v475_v19 }
 0x1c2   : > { %v698_v20 = vpop.f32.mrf.mxu0 }
 0x1c3   : > { %518 = vst.msk [vmem:[%s189_s30 + $0x18] sm:$0xff] %vm514_vm1, %v698_v20 }
 0x1c4   : > { %v485_v21 = vpop.f32.mrf.mxu0 }
 0x1c5   : > { %517 = vst.msk [vmem:[%s189_s30 + $0x10] sm:$0xff] %vm514_vm1, %v485_v21 }
 0x1c6   : > { %v701_v22 = vpop.f32.mrf.mxu0 }
 0x1c7   : > { %520 = vst.msk [vmem:[%s189_s30 + $0x28] sm:$0xff] %vm514_vm1, %v701_v22 }
 0x1c8   : > { %v495_v23 = vpop.f32.mrf.mxu0 }
 0x1c9   : > { %519 = vst.msk [vmem:[%s189_s30 + $0x20] sm:$0xff] %vm514_vm1, %v495_v23 }
 0x1ca   : > { %v704_v24 = vpop.f32.mrf.mxu0 }
 0x1cb   : > { %522 = vst.msk [vmem:[%s189_s30 + $0x38] sm:$0xff] %vm514_vm1, %v704_v24 }
 0x1cc   : > { %v505_v25 = vpop.f32.mrf.mxu0 }
 0x1cd   : > { %521 = vst.msk [vmem:[%s189_s30 + $0x30] sm:$0xff] %vm514_vm1, %v505_v25 }
 0x1ce   : > { %796 = shalt.err (!%p793_p10)
}
 0x1cf   : > { %s797_s19 = scalar_lea.hbm %s1027_s6, 1024  ;;  %s801_s26 = scalar_lea.hbm %s1075_s3, 2048 }
 0x1d0   : > { %p798_p0 = scmp.ne.s32.totalorder %s1027_s6, %s797_s19  ;;  %p802_p1 = scmp.lt.s32.totalorder %s1027_s6, %s1075_s3 }
 0x1d1   : > { %p803_p3 = scmp.lt.s32.totalorder %s801_s26, %s797_s19 }
 0x1d2   : > { %p799_p2 = pnand %p798_p0, %p1084_p12 }
 0x1d3   : > { %p804_p6 = por %p803_p3, %p802_p1 }
 0x1d4   : > { %p800_p9 = pneg %p799_p2 }
 0x1d6   : > { %p805_p11 = pnand %p804_p6, %p800_p9 }
 0x1d8   : > { %808 = shalt.err (!%p805_p11)
}
 0x1d9   : > { %s853_s29 = smov 128   ;;  %s854_s30 = smov 8  }
 0x1da   : > { %707 = dma.vmem_to_hbm [thread:$0]  (%p1084_p12), %s1021_s9, 1024, %s1027_s6, %s524_s16, %s853_s29, %s853_s29, %s854_s30  }
 0x1db PF: > { %s553_s10 = sand.u32 1, %s835_s12   ;;  %p1085_p13 = scmp.ne.s32.totalorder %s1081_s25, 0 }
 0x1dc   : > { %p1086_p4 = scmp.ge.s32.totalorder %s847_s15, 2  ;;  %s554_s11 = scalar_lea.sflag [#allocation4], %s553_s10 }
 0x1de   : > { %p714_p5 = pnand %p1086_p4, %p1085_p13 }
 0x1e0   : > { %p715_p7 = pneg %p714_p5 }
 0x1e2   : > { %830 = dma.done.wait (%p715_p7), %s554_s11, 1024  }
 0x1e3   : > { %832 = vsyncadd (%p715_p7), %s554_s11, 4294966272  ;;  %p16_p8 = scmp.ge.s32.totalorder %s900_s18, 4   ;;  %s1087_s12 = smov %s839_s13 }
 0x1e4   : > { %s1088_s13 = smov %s843_s14  ;;  %s1089_s14 = smov %s912_s21 }
 0x1e5   : > { %s1090_s15 = smov %s900_s18  ;;  %18 = sbr.rel (!%p16_p8) target bundleno = 5 (0x5), region = 77 }
 0x1ea   :  { %559 = vsyncpa [#allocation3], 1 }
 0x1eb   :  { %561 = vsyncpa [#allocation3 + $0x1], 1 }
 0x1ec   :  { %562 = vsyncpa [#allocation4], 1 }
 0x1ed   :  { %564 = vsyncpa [#allocation4 + $0x1], 1 }

</bundles_post_ra>
